<compile_context>
chip_gen: v7x
topology: tpu7x:2x2x1
jax: 0.10.0
libtpu: 0.0.40
codegen_flags: <defaults>
</compile_context>

<pallas_src>
import functools

import jax
import jax.numpy as jnp
from jax import lax
from jax.experimental import pallas as pl
from jax.experimental.pallas import tpu as pltpu

_EPS = 1e-6                               # matches F.pairwise_distance eps
_NUM_CORES = 2                            # v7x megacore split; harmless on 1-TC chips
_TARGET_TILE_BYTES = 2 * 1024 * 1024      # ~2 MiB per embedding block per step
_PIPELINE_CAP_BYTES = 20 * 1024 * 1024    # 4 inputs x 2 pipeline buffers


def _hinge_partial_kernel(margin_ref, a_ref, p_ref, n_ref, q_ref, out_ref, *,
                          batch, tile_b, blocks_per_core, needs_mask):
    """Per-core column sums of the hinge terms.

    out_ref block: (1, 1, 4) f32, resident across the inner ("arbitrary") axis.
    Columns: [margin-const (unused), tml(a,p,n), tml(a,p,nn), quadruplet].
    """
    core = pl.program_id(0)
    step = pl.program_id(1)

    @pl.when(step == 0)
    def _init():
        out_ref[...] = jnp.zeros_like(out_ref)

    margin = margin_ref[0]

    a = a_ref[...].astype(jnp.float32)
    p = p_ref[...].astype(jnp.float32)
    n = n_ref[...].astype(jnp.float32)
    q = q_ref[...].astype(jnp.float32)

    def sumsq(x, y):
        d = x - y + _EPS                  # |.| dropped: no-op before squaring
        return jnp.sum(d * d, axis=-1, keepdims=True)        # (tile_b, 1)

    # Tiny 4-column concat of single-lane results (NOT the old 4*D lane pack).
    ss = jnp.concatenate([sumsq(a, p), sumsq(a, n), sumsq(a, q), sumsq(n, q)],
                         axis=-1)                             # [ap, an, ann, nnn]
    dist = jnp.sqrt(ss)                                       # (tile_b, 4)
    hinge = jnp.maximum(margin + dist[:, 0:1] - dist, 0.0)    # (tile_b, 4)

    if needs_mask:
        blk = core * blocks_per_core + step                   # logical block index
        row = blk * tile_b + lax.broadcasted_iota(jnp.int32, (tile_b, 1), 0)
        hinge = jnp.where(row < batch, hinge, 0.0)

    out_ref[...] += jnp.sum(hinge, axis=0, keepdims=True).reshape(1, 1, 4)


def _choose_tile_b(batch, feat, itemsize):
    row_bytes = max(int(feat) * int(itemsize), 1)
    tile = _TARGET_TILE_BYTES // row_bytes
    tile = min(tile, _PIPELINE_CAP_BYTES // (4 * 2 * row_bytes))
    tile = max(8 * (tile // 8), 8)                     # multiple of 8 sublanes
    per_core = pl.cdiv(batch, _NUM_CORES)
    tile = min(tile, pl.cdiv(per_core, 8) * 8)         # no bigger than a core's share
    if tile >= batch:
        tile = batch                                   # one block == full dim (legal)
    return int(tile)


def my_loss_pallas(embed_anchor, embed_pos, embed_neg, embed_nn, dis,
                   sigma_weight, alpha1, alpha2, margin):
    B, D = embed_anchor.shape
    itemsize = jnp.dtype(embed_anchor.dtype).itemsize

    tile_b = _choose_tile_b(B, D, itemsize)
    total_blocks = pl.cdiv(B, tile_b)
    ncores = min(_NUM_CORES, total_blocks)
    bpc = pl.cdiv(total_blocks, ncores)                # blocks per core
    coverage = ncores * bpc * tile_b
    needs_mask = coverage != B

    embeds = (embed_anchor, embed_pos, embed_neg, embed_nn)
    if needs_mask:
        # Rare ragged-batch case: zero-pad to exact coverage so every DMA window
        # is fully in bounds; padded rows are masked out inside the kernel.
        pad = coverage - B
        embeds = tuple(jnp.pad(e, ((0, pad), (0, 0))) for e in embeds)

    emb_spec = pl.BlockSpec((tile_b, D), lambda c, i: (c * bpc + i, 0))

    # Explicit scoped-VMEM budget (4 inputs x 2 buffers + headroom); v5e's
    # default scoped limit is only 16 MiB so it must be raised explicitly.
    footprint = 4 * 2 * tile_b * D * int(itemsize)
    vmem_limit = int(min(96 * 1024 * 1024,
                         max(32 * 1024 * 1024, footprint + 8 * 1024 * 1024)))

    kernel = functools.partial(_hinge_partial_kernel, batch=B, tile_b=tile_b,
                               blocks_per_core=bpc, needs_mask=needs_mask)
    margin_arr = jnp.asarray([margin], dtype=jnp.float32)

    partials = pl.pallas_call(
        kernel,
        out_shape=jax.ShapeDtypeStruct((ncores, 1, 4), jnp.float32),
        grid=(ncores, bpc),
        in_specs=[
            pl.BlockSpec(memory_space=pltpu.SMEM),     # margin scalar
            emb_spec, emb_spec, emb_spec, emb_spec,    # anchor, pos, neg, nn
        ],
        out_specs=pl.BlockSpec((1, 1, 4), lambda c, i: (c, 0, 0)),
        compiler_params=pltpu.CompilerParams(
            dimension_semantics=("parallel", "arbitrary"),
            vmem_limit_bytes=vmem_limit),
    )(margin_arr, *embeds)

    # Tiny trailing epilogue: per-column means, sigma weights, mean(dis).
    col = jnp.sum(partials, axis=(0, 1)) / B           # [const, tml1, tml2, quad]
    s = jnp.reshape(sigma_weight, (-1,)).astype(jnp.float32)
    inv0 = 1.0 / (2.0 * s[0] * s[0])
    inv1 = 1.0 / (2.0 * s[1] * s[1])
    loss_tml = inv0 * col[3] + inv0 * col[1] + inv1 * col[2]
    # NOTE: `+torch.log(sigma0*sigma1)` in the original forward is a standalone
    # statement (a no-op) and is intentionally not included.
    loss_dis = jnp.mean(dis.astype(jnp.float32))
    return alpha1 * loss_tml + alpha2 * loss_dis


def reference_jax(embed_anchor, embed_pos, embed_neg, embed_nn, dis,
                  sigma_weight, alpha1, alpha2, margin):
    eps = 1e-6

    def pdist(x, y):
        return jnp.sqrt(jnp.sum(jnp.abs(x - y + eps) ** 2, axis=-1))

    d_ap = pdist(embed_anchor, embed_pos)
    d_an = pdist(embed_anchor, embed_neg)
    d_ann = pdist(embed_anchor, embed_nn)
    d_nnn = pdist(embed_neg, embed_nn)
    quad = jnp.mean(jnp.maximum(margin + d_ap - d_nnn, 0.0))
    tml1 = jnp.mean(jnp.maximum(d_ap - d_an + margin, 0.0))
    tml2 = jnp.mean(jnp.maximum(d_ap - d_ann + margin, 0.0))
    s = jnp.reshape(sigma_weight, (-1,))
    inv0 = 1.0 / (2.0 * s[0] ** 2)
    inv1 = 1.0 / (2.0 * s[1] ** 2)
    loss_tml = inv0 * quad + inv0 * tml1 + inv1 * tml2
    return alpha1 * loss_tml + alpha2 * jnp.mean(dis)


if __name__ == "__main__":
    key = jax.random.PRNGKey(0)
    keys = jax.random.split(key, 12)

    alpha1, alpha2, margin = 1.0, 0.5, 0.3
    # nn.Parameter(torch.Tensor(2,1)) + xavier_uniform_: U(-sqrt(6/3), +sqrt(6/3))
    bound = (6.0 / (1 + 2)) ** 0.5
    sigma_weight = jax.random.uniform(keys[0], (2, 1), dtype=jnp.float32,
                                      minval=-bound, maxval=bound)

    # Test 1: tiny batch (single block, single core).
    B, D = 8, 32
    ea = jax.random.normal(keys[1], (B, D), dtype=jnp.float32)
    ep = jax.random.normal(keys[2], (B, D), dtype=jnp.float32)
    en = jax.random.normal(keys[3], (B, D), dtype=jnp.float32)
    eq = jax.random.normal(keys[4], (B, D), dtype=jnp.float32)
    dis = jax.random.uniform(keys[5], (8, 8), dtype=jnp.float32)

    loss = my_loss_pallas(ea, ep, en, eq, dis, sigma_weight, alpha1, alpha2, margin)
    loss = jax.block_until_ready(loss)
    ref = reference_jax(ea, ep, en, eq, dis, sigma_weight, alpha1, alpha2, margin)
    assert jnp.allclose(loss, ref, rtol=1e-4, atol=1e-5), (loss, ref)

    # Test 2: ragged batch exercising the 2-core split, padding and row masking.
    B2, D2 = 260, 32
    ea2 = jax.random.normal(keys[6], (B2, D2), dtype=jnp.float32)
    ep2 = jax.random.normal(keys[7], (B2, D2), dtype=jnp.float32)
    en2 = jax.random.normal(keys[8], (B2, D2), dtype=jnp.float32)
    eq2 = jax.random.normal(keys[9], (B2, D2), dtype=jnp.float32)
    dis2 = jax.random.uniform(keys[10], (4, 4), dtype=jnp.float32)

    loss2 = my_loss_pallas(ea2, ep2, en2, eq2, dis2, sigma_weight,
                           alpha1, alpha2, margin)
    loss2 = jax.block_until_ready(loss2)
    ref2 = reference_jax(ea2, ep2, en2, eq2, dis2, sigma_weight,
                         alpha1, alpha2, margin)
    assert jnp.allclose(loss2, ref2, rtol=1e-4, atol=1e-5), (loss2, ref2)

    print("KERNEL_OK")
</pallas_src>

<mosaic_0001>
module attributes {stable_mosaic.version = 11 : i64} {
  func.func @_hinge_partial_kernel(%arg0: i32, %arg1: i32, %arg2: memref<1xf32, #tpu.memory_space<smem>>, %arg3: memref<8x32xf32, #tpu.memory_space<vmem>>, %arg4: memref<8x32xf32, #tpu.memory_space<vmem>>, %arg5: memref<8x32xf32, #tpu.memory_space<vmem>>, %arg6: memref<8x32xf32, #tpu.memory_space<vmem>>, %arg7: memref<1x1x4xf32, #tpu.memory_space<vmem>>) attributes {dimension_semantics = [#tpu.dimension_semantics<parallel>, #tpu.dimension_semantics<arbitrary>], iteration_bounds = array<i64: 1, 1>, scalar_prefetch = 0 : i64, scratch_operands = 0 : i64, tpu.core_type = #tpu.core_type<tc>, window_params = [{transform_indices = @transform_0, window_bounds = array<i64: 1>}, {transform_indices = @transform_1, window_bounds = array<i64: 8, 32>}, {transform_indices = @transform_2, window_bounds = array<i64: 8, 32>}, {transform_indices = @transform_3, window_bounds = array<i64: 8, 32>}, {transform_indices = @transform_4, window_bounds = array<i64: 8, 32>}, {transform_indices = @transform_5, window_bounds = array<i64: 1, 1, 4>}]} {
    %c0_i32 = arith.constant 0 : i32
    %0 = arith.cmpi eq, %arg1, %c0_i32 : i32
    %1 = arith.extui %0 : i1 to i32
    %c0_i32_0 = arith.constant 0 : i32
    %2 = arith.cmpi ne, %1, %c0_i32_0 : i32
    scf.if %2 {
      %cst_24 = arith.constant 0.000000e+00 : f32
      %47 = vector.broadcast %cst_24 : f32 to vector<1x1x4xf32>
      %c0_25 = arith.constant 0 : index
      %c0_26 = arith.constant 0 : index
      %c0_27 = arith.constant 0 : index
      %48 = vector.load %arg7[%c0_25, %c0_26, %c0_27] : memref<1x1x4xf32, #tpu.memory_space<vmem>>, vector<1x1x4xf32>
      tpu.vector_store %arg7[%c0_25, %c0_26, %c0_27], %47 {strides = array<i32>} : memref<1x1x4xf32, #tpu.memory_space<vmem>>, vector<1x1x4xf32>,
    } else {
    }
    %c0 = arith.constant 0 : index
    %3 = memref.load %arg2[%c0] : memref<1xf32, #tpu.memory_space<smem>>
    %c0_1 = arith.constant 0 : index
    %c0_2 = arith.constant 0 : index
    %4 = vector.load %arg3[%c0_1, %c0_2] : memref<8x32xf32, #tpu.memory_space<vmem>>, vector<8x32xf32>
    %c0_3 = arith.constant 0 : index
    %c0_4 = arith.constant 0 : index
    %5 = vector.load %arg4[%c0_3, %c0_4] : memref<8x32xf32, #tpu.memory_space<vmem>>, vector<8x32xf32>
    %c0_5 = arith.constant 0 : index
    %c0_6 = arith.constant 0 : index
    %6 = vector.load %arg5[%c0_5, %c0_6] : memref<8x32xf32, #tpu.memory_space<vmem>>, vector<8x32xf32>
    %c0_7 = arith.constant 0 : index
    %c0_8 = arith.constant 0 : index
    %7 = vector.load %arg6[%c0_7, %c0_8] : memref<8x32xf32, #tpu.memory_space<vmem>>, vector<8x32xf32>
    %8 = arith.subf %4, %5 : vector<8x32xf32>
    %cst = arith.constant 9.99999997E-7 : f32
    %9 = vector.broadcast %cst : f32 to vector<8x32xf32>
    %10 = arith.addf %8, %9 : vector<8x32xf32>
    %11 = arith.mulf %10, %10 : vector<8x32xf32>
    %cst_9 = arith.constant dense<0.000000e+00> : vector<8xf32>
    %12 = vector.multi_reduction <add>, %11, %cst_9 [1] : vector<8x32xf32> to vector<8xf32>
    %13 = vector.shape_cast %12 : vector<8xf32> to vector<8x1xf32>
    %14 = arith.subf %4, %6 : vector<8x32xf32>
    %cst_10 = arith.constant 9.99999997E-7 : f32
    %15 = vector.broadcast %cst_10 : f32 to vector<8x32xf32>
    %16 = arith.addf %14, %15 : vector<8x32xf32>
    %17 = arith.mulf %16, %16 : vector<8x32xf32>
    %cst_11 = arith.constant dense<0.000000e+00> : vector<8xf32>
    %18 = vector.multi_reduction <add>, %17, %cst_11 [1] : vector<8x32xf32> to vector<8xf32>
    %19 = vector.shape_cast %18 : vector<8xf32> to vector<8x1xf32>
    %20 = arith.subf %4, %7 : vector<8x32xf32>
    %cst_12 = arith.constant 9.99999997E-7 : f32
    %21 = vector.broadcast %cst_12 : f32 to vector<8x32xf32>
    %22 = arith.addf %20, %21 : vector<8x32xf32>
    %23 = arith.mulf %22, %22 : vector<8x32xf32>
    %cst_13 = arith.constant dense<0.000000e+00> : vector<8xf32>
    %24 = vector.multi_reduction <add>, %23, %cst_13 [1] : vector<8x32xf32> to vector<8xf32>
    %25 = vector.shape_cast %24 : vector<8xf32> to vector<8x1xf32>
    %26 = arith.subf %6, %7 : vector<8x32xf32>
    %cst_14 = arith.constant 9.99999997E-7 : f32
    %27 = vector.broadcast %cst_14 : f32 to vector<8x32xf32>
    %28 = arith.addf %26, %27 : vector<8x32xf32>
    %29 = arith.mulf %28, %28 : vector<8x32xf32>
    %cst_15 = arith.constant dense<0.000000e+00> : vector<8xf32>
    %30 = vector.multi_reduction <add>, %29, %cst_15 [1] : vector<8x32xf32> to vector<8xf32>
    %31 = vector.shape_cast %30 : vector<8xf32> to vector<8x1xf32>
    %32 = tpu.concatenate %13, %19, %25, %31 in 1 : vector<8x1xf32>, vector<8x1xf32>, vector<8x1xf32>, vector<8x1xf32> -> vector<8x4xf32>
    %33 = math.sqrt %32 : vector<8x4xf32>
    %34 = vector.extract_strided_slice %33 {offsets = [0, 0], sizes = [8, 1], strides = [1, 1]} : vector<8x4xf32> to vector<8x1xf32>
    %35 = vector.broadcast %3 : f32 to vector<8x1xf32>
    %36 = arith.addf %35, %34 : vector<8x1xf32>
    %37 = vector.broadcast %36 : vector<8x1xf32> to vector<8x4xf32>
    %38 = arith.subf %37, %33 : vector<8x4xf32>
    %cst_16 = arith.constant 0.000000e+00 : f32
    %39 = vector.broadcast %cst_16 : f32 to vector<8x4xf32>
    %40 = arith.maximumf %38, %39 : vector<8x4xf32>
    %c0_17 = arith.constant 0 : index
    %c0_18 = arith.constant 0 : index
    %c0_19 = arith.constant 0 : index
    %41 = vector.load %arg7[%c0_17, %c0_18, %c0_19] : memref<1x1x4xf32, #tpu.memory_space<vmem>>, vector<1x1x4xf32>
    %cst_20 = arith.constant dense<0.000000e+00> : vector<4xf32>
    %42 = vector.multi_reduction <add>, %40, %cst_20 [0] : vector<8x4xf32> to vector<4xf32>
    %43 = vector.shape_cast %42 : vector<4xf32> to vector<1x4xf32>
    %44 = vector.shape_cast %43 : vector<1x4xf32> to vector<1x1x4xf32>
    %45 = arith.addf %41, %44 : vector<1x1x4xf32>
    %c0_21 = arith.constant 0 : index
    %c0_22 = arith.constant 0 : index
    %c0_23 = arith.constant 0 : index
    %46 = vector.load %arg7[%c0_21, %c0_22, %c0_23] : memref<1x1x4xf32, #tpu.memory_space<vmem>>, vector<1x1x4xf32>
    tpu.vector_store %arg7[%c0_21, %c0_22, %c0_23], %45 {strides = array<i32>} : memref<1x1x4xf32, #tpu.memory_space<vmem>>, vector<1x1x4xf32>,
    return
  }
  func.func @transform_0(%arg0: i32, %arg1: i32) -> i32 {
    %c0_i32 = arith.constant 0 : i32
    %c0_i32_0 = arith.constant 0 : i32
    return %c0_i32 : i32
  }
  func.func @transform_1(%arg0: i32, %arg1: i32) -> (i32, i32) {
    %c1_i32 = arith.constant 1 : i32
    %0 = arith.muli %arg0, %c1_i32 : i32
    %1 = arith.addi %0, %arg1 : i32
    %c0_i32 = arith.constant 0 : i32
    %c0_i32_0 = arith.constant 0 : i32
    return %1, %c0_i32 : i32, i32
  }
  func.func @transform_2(%arg0: i32, %arg1: i32) -> (i32, i32) {
    %c1_i32 = arith.constant 1 : i32
    %0 = arith.muli %arg0, %c1_i32 : i32
    %1 = arith.addi %0, %arg1 : i32
    %c0_i32 = arith.constant 0 : i32
    %c0_i32_0 = arith.constant 0 : i32
    return %1, %c0_i32 : i32, i32
  }
  func.func @transform_3(%arg0: i32, %arg1: i32) -> (i32, i32) {
    %c1_i32 = arith.constant 1 : i32
    %0 = arith.muli %arg0, %c1_i32 : i32
    %1 = arith.addi %0, %arg1 : i32
    %c0_i32 = arith.constant 0 : i32
    %c0_i32_0 = arith.constant 0 : i32
    return %1, %c0_i32 : i32, i32
  }
  func.func @transform_4(%arg0: i32, %arg1: i32) -> (i32, i32) {
    %c1_i32 = arith.constant 1 : i32
    %0 = arith.muli %arg0, %c1_i32 : i32
    %1 = arith.addi %0, %arg1 : i32
    %c0_i32 = arith.constant 0 : i32
    %c0_i32_0 = arith.constant 0 : i32
    return %1, %c0_i32 : i32, i32
  }
  func.func @transform_5(%arg0: i32, %arg1: i32) -> (i32, i32, i32) {
    %c0_i32 = arith.constant 0 : i32
    %c0_i32_0 = arith.constant 0 : i32
    %c0_i32_1 = arith.constant 0 : i32
    return %arg0, %c0_i32, %c0_i32_0 : i32, i32, i32
  }
}

</mosaic_0001>

<bundles_post_ra>
// kernel: tpu_custom_call.1
= control target key start
LH: loop header
LB: loop body
LE: loop exit
PB: predicated region body
PF: predicated region fallthrough
CT: control target
= control target key end

     0   :  { %11 = vsyncpa [#allocation4], 0  ;;  %s373_s0 = inlined_call_operand.<no memory space> [shape: f32[1], index: 0, kind: input, shape index: {}]   ;;  %s374_s1 = inlined_call_operand.hbm [shape: f32[8,32], index: 1, kind: input, shape index: {}]   ;;  %s375_s2 = inlined_call_operand.hbm [shape: f32[8,32], index: 2, kind: input, shape index: {}]   ;;  %s376_s3 = inlined_call_operand.vmem [shape: f32[8,32], index: 3, kind: input, shape index: {}]   ;;  %s377_s4 = inlined_call_operand.hbm [shape: f32[8,32], index: 4, kind: input, shape index: {}]   ;;  %s378_s5 = inlined_call_operand.hbm [shape: f32[1,1,4], index: 5, kind: output, shape index: {}]  }
   0x1   :  { %12 = vsyncpa [#allocation7], 0 }
   0x2   :  { %13 = vsyncpa [#allocation5], 0  ;;  %s281_s18 = smov [#allocation6]   ;;  %s282_s20 = smov [#allocation3]  }
   0x3   :  { %s38_s19 = sshll.u32 %s281_s18, 4  ;;  %s25_s21 = sshll.u32 %s282_s20, 4  ;;  %s39_s19 = int_to_ptr.vmem [resolvable:$true] %s38_s19  ;;  %s26_s21 = int_to_ptr.vmem [resolvable:$true] %s25_s21 }
   0x4   :  { %s187_s24 = scalar_lea.hbm %s375_s2, 128 }
   0x5   :  { %p188_p0 = scmp.ne.s32.totalorder %s375_s2, %s187_s24  ;;  %p191_p1 = scmp.lt.u32.totalorder %s187_s24, %s375_s2 }
   0x7   :  { %p193_p2 = pnand %p191_p1, %p188_p0 }
   0x9   :  { %196 = shalt.err (!%p193_p2)
}
   0xa   :  { %s197_s29 = scalar_lea.vmem %s39_s19, 128  ;;  %p202_p4 = scmp.lt.s32.totalorder %s39_s19, %s39_s19 }
   0xb   :  { %p198_p3 = scmp.ne.s32.totalorder %s39_s19, %s197_s29  ;;  %p203_p5 = scmp.lt.s32.totalorder %s197_s29, %s197_s29 }
   0xd   :  { %p204_p6 = por %p203_p5, %p202_p4 }
   0xf   :  { %p205_p7 = pnand %p204_p6, %p198_p3 }
  0x11   :  { %208 = shalt.err (!%p205_p7)
}
  0x12   :  { %41 = dma.hbm_to_vmem [thread:$0]  %s375_s2, 128, %s39_s19, [#allocation7]  }
  0x13   :  { %s209_s9 = scalar_lea.hbm %s374_s1, 128 }
  0x14   :  { %p210_p8 = scmp.ne.s32.totalorder %s374_s1, %s209_s9  ;;  %p213_p9 = scmp.lt.u32.totalorder %s209_s9, %s374_s1 }
  0x16   :  { %p215_p10 = pnand %p213_p9, %p210_p8 }
  0x18   :  { %218 = shalt.err (!%p215_p10)
}
  0x19   :  { %s219_s14 = scalar_lea.vmem %s26_s21, 128  ;;  %p224_p12 = scmp.lt.s32.totalorder %s26_s21, %s26_s21 }
  0x1a   :  { %p220_p11 = scmp.ne.s32.totalorder %s26_s21, %s219_s14  ;;  %p225_p13 = scmp.lt.s32.totalorder %s219_s14, %s219_s14 }
  0x1c   :  { %p226_p0 = por %p225_p13, %p224_p12 }
  0x1e   :  { %p227_p1 = pnand %p226_p0, %p220_p11 }
  0x20   :  { %230 = shalt.err (!%p227_p1)
}
  0x21   :  { %28 = dma.hbm_to_vmem [thread:$0]  %s374_s1, 128, %s26_s21, [#allocation4]  }
  0x22   :  { %s283_s16 = smov [#allocation8]   ;;  %s231_s20 = scalar_lea.hbm %s377_s4, 128 }
  0x23   :  { %s59_s17 = sshll.u32 %s283_s16, 4  ;;  %p232_p2 = scmp.ne.s32.totalorder %s377_s4, %s231_s20  ;;  %s60_s17 = int_to_ptr.vmem [resolvable:$true] %s59_s17 }
  0x24   :  { %p235_p3 = scmp.lt.u32.totalorder %s231_s20, %s377_s4 }
  0x26   :  { %p237_p4 = pnand %p235_p3, %p232_p2 }
  0x28   :  { %240 = shalt.err (!%p237_p4)
}
  0x29   :  { %s241_s26 = scalar_lea.vmem %s60_s17, 128  ;;  %p246_p6 = scmp.lt.s32.totalorder %s60_s17, %s60_s17 }
  0x2a   :  { %p242_p5 = scmp.ne.s32.totalorder %s60_s17, %s241_s26  ;;  %p247_p7 = scmp.lt.s32.totalorder %s241_s26, %s241_s26 }
  0x2c   :  { %p248_p8 = por %p247_p7, %p246_p6 }
  0x2e   :  { %p249_p9 = pnand %p248_p8, %p242_p5 }
  0x30   :  { %252 = shalt.err (!%p249_p9)
}
  0x31   :  { %62 = dma.hbm_to_vmem [thread:$0]  %s377_s4, 128, %s60_s17, [#allocation7]  }
  0x32   :  { %275 = dma.done.wait [#allocation4], 128  }
  0x33   :  { %276 = vsyncadd [#allocation4], 4294967168 }
  0x34   :  { %277 = dma.done.wait [#allocation7], 256  }
  0x35   :  { %278 = vsyncadd [#allocation7], 4294967040  ;;  %v93_v0 = vld [vmem:[#allocation3] sm:$0xff]  ;;  %v94_v1 = vld [vmem:[#allocation6] sm:$0xff]  ;;  %vm100_vm0 = vcmask 261120   ;;  %v284_v20 = vmov 0   ;;  %v135_v31 = vstv %s373_s0 }
  0x36   :  { %v96_v2 = vld [vmem:[#allocation8] sm:$0xff]  ;;  %v97_v3 = vsub.f32 %v93_v0, %v94_v1  ;;  %v95_v5 = vld [vmem:[%s376_s3] sm:$0xff]  ;;  %184 = vset.pattern.permute.xlu0 %v284_v20  ;;  %vm122_vm1 = vcmask 7168   ;;  %vm124_vm2 = vcmask 15360   ;;  %vm126_vm3 = vcmask 23552   ;;  %s286_s0 = smov [#allocation9]  }
  0x37   :  { %v110_v4 = vsub.f32 %v93_v0, %v96_v2  ;;  %v104_v6 = vsub.f32 %v93_v0, %v95_v5  ;;  %v116_v7 = vsub.f32 %v95_v5, %v96_v2  ;;  %vm90_vm6 = vcmask 24576   ;;  %s162_s29 = sshll.u32 %s286_s0, 4  ;;  %s163_s29 = int_to_ptr.vmem [resolvable:$true] %s162_s29 }
  0x38   :  { %v98_v8 = vadd.f32 1e-06, %v97_v3  ;;  %v285_v35 = vmov 0.0   ;;  %vm145_vm7 = vcmask 31744   ;;  %s253_s30 = scalar_lea.vmem %s163_s29, 16  ;;  %s257_s6 = scalar_lea.vmem %s163_s29, 32 }
  0x39   :  { %v111_v9 = vadd.f32 1e-06, %v110_v4  ;;  %v105_v10 = vadd.f32 1e-06, %v104_v6  ;;  %v117_v11 = vadd.f32 1e-06, %v116_v7  ;;  %p254_p10 = scmp.ne.s32.totalorder %s163_s29, %s253_s30  ;;  %p258_p11 = scmp.lt.s32.totalorder %s163_s29, %s163_s29 }
  0x3a   :  { %v99_v12 = vmul.f32 %v98_v8, %v98_v8  ;;  %91 = vst.msk [vmem:[#allocation9] sm:$0x1] %vm90_vm6, %v285_v35  ;;  %p259_p12 = scmp.lt.s32.totalorder %s257_s6, %s253_s30 }
  0x3b   :  { %v112_v13 = vmul.f32 %v111_v9, %v111_v9  ;;  %v106_v14 = vmul.f32 %v105_v10, %v105_v10  ;;  %v118_v15 = vmul.f32 %v117_v11, %v117_v11 }
  0x3c   :  { %v101_v16 = vsel %vm100_vm0, %v99_v12, 0.0  ;;  %p260_p13 = por %p259_p12, %p258_p11 }
  0x3d   :  { %v113_v17 = vsel %vm100_vm0, %v112_v13, 0.0  ;;  %102 = vadd.xlane.f32.xlu0 %v101_v16  ;;  %v107_v18 = vsel %vm100_vm0, %v106_v14, 0.0  ;;  %v119_v19 = vsel %vm100_vm0, %v118_v15, 0.0 }
  0x3e   :  { %114 = vadd.xlane.f32.xlu1 %v113_v17  ;;  %p261_p0 = pnand %p260_p13, %p254_p10 }
  0x41   :  { %108 = vadd.xlane.f32.xlu0 %v107_v18  ;;  %v144_v45 = vld [vmem:[#allocation9] sm:$0x1] }
  0x42   :  { %120 = vadd.xlane.f32.xlu1 %v119_v19 }
  0xca   :  { %v103_v21 = vpop.xlane.xlu0 %102 }
  0xcb   :  { %v115_v22 = vpop.xlane.xlu1 %114 }
  0xce   :  { %v109_v23 = vpop.xlane.xlu0 %108 }
  0xcf   :  { %v121_v24 = vpop.xlane.xlu1 %120  ;;  %v123_v25 = vsel %vm122_vm1, %v103_v21, %v109_v23 }
  0xd0   :  { %v125_v26 = vsel %vm124_vm2, %v123_v25, %v115_v22 }
  0xd1   :  { %v127_v27 = vsel %vm126_vm3, %v125_v26, %v121_v24 }
  0xd2   :  { %185 = vrsqrt.f32 %v127_v27  ;;  %vm130_vm4 = vcmp.eq.f32.partialorder %v127_v27, inf  ;;  %v133_v30 = vand.u32 2147483648, %v127_v27  ;;  %vm132_vm5 = vcmp.eq.f32.partialorder %v127_v27, 0.0 }
  0xdc   :  { %v186_v28 = vpop.eup %185 }
  0xdd   :  { %v129_v29 = vmul.f32 %v186_v28, %v127_v27 }
  0xdf   :  { %v131_v32 = vsel %vm130_vm4, %v127_v27, %v129_v29 }
  0xe0   :  { %v134_v33 = vsel %vm132_vm5, %v133_v30, %v131_v32 }
  0xe1   :  { %v136_v34 = vadd.f32 %v135_v31, %v134_v33 }
  0xe3   :  { %139 = vperm.xlu0 %184, %v136_v34  }
 0x162   :  { %v140_v36 = vpop.permute.xlu0 %139 }
 0x163   :  { %v142_v37 = vsub.f32 %v140_v36, %v134_v33 }
 0x165   :  { %v143_v38 = vmax.f32 %v142_v37, 0.0 }
 0x167   :  { %v146_v39 = vsel %vm145_vm7, %v143_v38, 0.0 }
 0x168   :  { %v147_v40 = vrot.slane %v146_v39, 4 }
 0x16a   :  { %v148_v41 = vadd.f32 %v147_v40, %v146_v39 }
 0x16c   :  { %v149_v42 = vrot.slane %v148_v41, 2 }
 0x16e   :  { %v150_v43 = vadd.f32 %v149_v42, %v148_v41 }
 0x170   :  { %v151_v44 = vrot.slane %v150_v43, 1 }
 0x172   :  { %v152_v46 = vadd.f32 %v151_v44, %v150_v43 }
 0x174   :  { %v153_v47 = vadd.f32 %v152_v46, %v144_v45 }
 0x176   :  { %155 = vst.msk [vmem:[#allocation9] sm:$0x1] %vm90_vm6, %v153_v47 }
 0x177   :  { %264 = shalt.err (!%p261_p0)
}
 0x178   :  { %s265_s9 = scalar_lea.hbm %s378_s5, 16 }
 0x179   :  { %p266_p1 = scmp.ne.s32.totalorder %s378_s5, %s265_s9  ;;  %p269_p2 = scmp.lt.u32.totalorder %s265_s9, %s378_s5 }
 0x17b   :  { %p271_p3 = pnand %p269_p2, %p266_p1 }
 0x17d   :  { %274 = shalt.err (!%p271_p3)
}
 0x17e   :  { %165 = dma.vmem_to_hbm [thread:$0]  %s163_s29, 16, %s378_s5, [#allocation5]  }
 0x17f   :  { %279 = dma.done.wait [#allocation5], 16  }
 0x180   :  { %280 = vsyncadd [#allocation5], 4294967280 }
 0x181   :  { %169 = vsyncpa [#allocation4], 1 }
 0x182   :  { %170 = vsyncpa [#allocation7], 1 }
 0x183   :  { %171 = vsyncpa [#allocation5], 1 }

</bundles_post_ra>
